<compile_context>
chip_gen: v6e
topology: v6e:2x2x1
jax: 0.10.0
libtpu: 0.0.40
codegen_flags: <defaults>
</compile_context>

<pallas_src>
import functools

import jax
import jax.numpy as jnp
import numpy as np
from jax.experimental import pallas as pl
from jax.experimental.pallas import tpu as pltpu

NOISE_MIN = 0.4
NOISE_MAX = 0.7


# ----------------------------- Pallas kernel -----------------------------

def _stdgi_kernel(x_ref, adjT_ref, p_ref, out_ref, *, k, fin, fout, hid, bn_pad):
    """Single invocation; whole (tiny) problem lives in VMEM.

    Layout: nodes (batch folded in, padded to BNpad=mult of 128) on the lane axis,
    features on sublanes.
      x_ref   : [Fin, 3*BNpad]   = [ xT | x_kT | x_cT ]   (MXU dtype)
      adjT    : [BNpad, BNpad]   block-diag row-normalized adjacency, transposed
      p_ref   : [Rpad, Lp] f32 parameter slab:
                  rows [0:Fout)            : w_encT in cols [0:Fin), b_enc at col Fin
                  rows [Fout:Fout+hid)     : w_bil  flattened [hid, Fout*Fin]
                  row  Fout+hid            : w_lin in cols [0:hid), b_lin at col hid
                  rows [Fout+hid+1 : +hid) : b_bil in col 0
      out_ref : [1, 2*BNpad]     lanes [0:BNpad)=positive score, [BNpad:)=corrupted
    """
    cdt = x_ref.dtype                      # MXU operand dtype (f32 or bf16)
    m = 2 * bn_pad

    adjT = adjT_ref[...]                   # [BNpad, BNpad]
    params = p_ref[...]                    # small f32 slab, loaded once

    # --- GraphSage encoder (mean aggregator, k hops), transposed:
    #     h <- h @ adj_n^T  ==  (adj_n @ h^T)^T
    h = x_ref[:, 0:bn_pad]                                   # [Fin, BNpad]
    for _ in range(k):
        h = jnp.dot(h, adjT, preferred_element_type=jnp.float32).astype(cdt)

    w_encT = params[0:fout, 0:fin].astype(cdt)               # [Fout, Fin]
    b_enc = params[0:fout, fin:fin + 1]                      # [Fout, 1] f32
    h = jnp.maximum(
        jnp.dot(w_encT, h, preferred_element_type=jnp.float32) + b_enc,
        0.0)                                                 # [Fout, BNpad] f32

    # --- Bilinear discriminator: pos & corrupted in ONE lane-concatenated pass.
    # u[g*Fin + f, lane] = h[g, lane] * xin[f, lane]  (per-lane outer product),
    # then s = W_bil[hid, Fout*Fin] @ u  -> MXU contraction K = Fout*Fin.
    x_pn = x_ref[:, bn_pad:3 * bn_pad].astype(jnp.float32)   # [Fin, 2*BNpad] (VPU in f32)
    h2 = jnp.concatenate([h, h], axis=-1)                    # [Fout, 2*BNpad] (shared h)
    u = (h2[:, None, :] * x_pn[None, :, :]).reshape(fout * fin, m)
    # NOTE: row order g*Fin+f matches the wrapper's w_bil.reshape(hid, Fout*Fin).

    w_bil2 = params[fout:fout + hid, 0:fout * fin].astype(cdt)        # [hid, Fout*Fin]
    b_bil = params[fout + hid + 1:fout + 2 * hid + 1, 0:1]            # [hid, 1] f32
    s = jnp.maximum(
        jnp.dot(w_bil2, u.astype(cdt), preferred_element_type=jnp.float32) + b_bil,
        0.0)                                                 # [hid, 2*BNpad] f32

    w_lin = params[fout + hid:fout + hid + 1, 0:hid]                  # [1, hid]
    b_lin = params[fout + hid:fout + hid + 1, hid:hid + 1]            # [1, 1]
    logit = jnp.dot(w_lin, s, preferred_element_type=jnp.float32) + b_lin  # [1, 2*BNpad]

    out_ref[...] = jax.nn.sigmoid(logit)                     # single lane-dense store


def stdgi_pallas(x, x_k, x_c, adj, params, *, k, mxu_dtype=jnp.float32):
    B, N, Fin = x.shape
    Fout = params["w_enc"].shape[1]
    hid = params["w_bil"].shape[0]
    BN = B * N
    BNpad = ((BN + 127) // 128) * 128          # pad nodes to full lane width

    # ---- wrapper-side plumbing (done once, outside the kernel) ----
    eps = 1e-12                                # guard against zero-sum adjacency rows
    adj_n = adj / (jnp.sum(adj, axis=-1, keepdims=True) + eps)
    # Block-diagonal normalized adjacency (batch folded into node axis), transposed.
    # NOTE: assumes the SAME [N, N] adjacency for every batch element (as in the
    # reference module); a per-batch adjacency would need per-batch blocks here.
    adj_bd_T = jnp.kron(jnp.eye(B, dtype=adj.dtype), adj_n.T)             # [BN, BN]
    adjT = jnp.zeros((BNpad, BNpad), mxu_dtype).at[:BN, :BN].set(
        adj_bd_T.astype(mxu_dtype))

    def to_T(a):                               # [B, N, Fin] -> padded [Fin, BNpad]
        aT = a.reshape(BN, Fin).T
        return jnp.zeros((Fin, BNpad), mxu_dtype).at[:, :BN].set(aT.astype(mxu_dtype))

    x_slab = jnp.concatenate([to_T(x), to_T(x_k), to_T(x_c)], axis=1)     # [Fin, 3*BNpad]

    # ---- single f32 parameter slab (one DMA for all small weights/biases) ----
    Lp = max(Fin + 1, Fout * Fin, hid + 1)
    Lp = ((Lp + 127) // 128) * 128
    R = Fout + 2 * hid + 1
    Rpad = ((R + 7) // 8) * 8
    P = jnp.zeros((Rpad, Lp), jnp.float32)
    P = P.at[0:Fout, 0:Fin].set(params["w_enc"].T)                        # w_encT
    P = P.at[0:Fout, Fin].set(params["b_enc"].reshape(Fout))              # b_enc
    P = P.at[Fout:Fout + hid, 0:Fout * Fin].set(
        params["w_bil"].reshape(hid, Fout * Fin))                         # w_bil [j, g*Fin+f]
    P = P.at[Fout + hid, 0:hid].set(params["w_lin"].reshape(hid))         # w_lin
    P = P.at[Fout + hid, hid].set(params["b_lin"].reshape(()))            # b_lin
    P = P.at[Fout + hid + 1:Fout + 2 * hid + 1, 0].set(
        params["b_bil"].reshape(hid))                                     # b_bil

    kernel = functools.partial(_stdgi_kernel, k=k, fin=Fin, fout=Fout,
                               hid=hid, bn_pad=BNpad)
    vmem = pl.BlockSpec(memory_space=pltpu.MemorySpace.VMEM)

    out = pl.pallas_call(
        kernel,
        out_shape=jax.ShapeDtypeStruct((1, 2 * BNpad), jnp.float32),
        in_specs=[vmem, vmem, vmem],           # 3 input DMAs + 1 output DMA total
        out_specs=vmem,
    )(x_slab, adjT, P)

    pos = out[0, :BN].reshape(B, N)
    neg = out[0, BNpad:BNpad + BN].reshape(B, N)
    return jnp.stack([pos, neg], axis=-1)      # [B, N, 2]


# ----------------------------- glue (plain JAX) -----------------------------

def corrupt(x_k, key, noise_min=NOISE_MIN, noise_max=NOISE_MAX):
    """X: [B, N, F] -> uniform-scaled, node-permuted copy (the STDGI.corrupt)."""
    kp, ks = jax.random.split(key)
    idx = jax.random.permutation(kp, x_k.shape[1])
    scale = jax.random.uniform(ks, (), minval=noise_min, maxval=noise_max)
    return scale * x_k[:, idx, :]


def stdgi_reference(x, x_k, x_c, adj, params, *, k):
    """Pure-JAX reference of the same math for a correctness check."""
    adj_n = adj / (jnp.sum(adj, axis=-1, keepdims=True) + 1e-12)
    h = x
    for _ in range(k):
        h = jnp.einsum("ij,bjf->bif", adj_n, h)
    h = jax.nn.relu(jnp.einsum("bnf,fo->bno", h, params["w_enc"]) + params["b_enc"])

    def disc(xin):
        s = jnp.einsum("bno,jof,bnf->bnj", h, params["w_bil"], xin) + params["b_bil"]
        s = jax.nn.relu(s)
        return jax.nn.sigmoid(jnp.einsum("bnj,jo->bno", s, params["w_lin"])
                              + params["b_lin"])

    return jnp.concatenate([disc(x_k), disc(x_c)], axis=-1)


def init_params(key, in_ft, out_ft, dis_hid):
    ks = jax.random.split(key, 6)
    scale = 0.1
    return dict(
        w_enc=scale * jax.random.normal(ks[0], (in_ft, out_ft), jnp.float32),
        b_enc=scale * jax.random.normal(ks[1], (1, out_ft), jnp.float32),
        w_bil=scale * jax.random.normal(ks[2], (dis_hid, out_ft, in_ft), jnp.float32),
        b_bil=scale * jax.random.normal(ks[3], (1, dis_hid), jnp.float32),
        w_lin=scale * jax.random.normal(ks[4], (dis_hid, 1), jnp.float32),
        b_lin=scale * jax.random.normal(ks[5], (1, 1), jnp.float32),
    )


# ----------------------------- main -----------------------------

if __name__ == "__main__":
    B, N = 2, 16            # batch, n_stations (nodes)
    IN_FT, OUT_FT, DIS_HID = 8, 16, 8
    K = 2                   # GraphSage hops

    root = jax.random.PRNGKey(0)
    k_x, k_xk, k_adj, k_par, k_cor = jax.random.split(root, 5)

    x = jax.random.normal(k_x, (B, N, IN_FT), jnp.float32)
    x_k = jax.random.normal(k_xk, (B, N, IN_FT), jnp.float32)
    adj = jax.random.uniform(k_adj, (N, N), jnp.float32, minval=0.1, maxval=1.0)

    params = init_params(k_par, IN_FT, OUT_FT, DIS_HID)

    # corruption (random permutation + uniform scale) is glue, done in JAX
    x_c = corrupt(x_k, k_cor)

    ref = stdgi_reference(x, x_k, x_c, adj, params, k=K)

    # f32 MXU operands (exact path)
    out = jax.block_until_ready(
        stdgi_pallas(x, x_k, x_c, adj, params, k=K, mxu_dtype=jnp.float32))
    np.testing.assert_allclose(np.asarray(out), np.asarray(ref), rtol=2e-3, atol=2e-3)

    # bf16 MXU operands (v6e/v7x fast path; f32 accumulation & VPU elementwise)
    out_bf16 = jax.block_until_ready(
        stdgi_pallas(x, x_k, x_c, adj, params, k=K, mxu_dtype=jnp.bfloat16))
    np.testing.assert_allclose(np.asarray(out_bf16), np.asarray(ref),
                               rtol=3e-2, atol=3e-2)

    assert out.shape == (B, N, 2)
    print("KERNEL_OK")
</pallas_src>

<mosaic_0001>
module attributes {stable_mosaic.version = 11 : i64} {
  func.func @_stdgi_kernel(%arg0: memref<8x384xf32, #tpu.memory_space<vmem>>, %arg1: memref<128x128xf32, #tpu.memory_space<vmem>>, %arg2: memref<40x128xf32, #tpu.memory_space<vmem>>, %arg3: memref<1x256xf32, #tpu.memory_space<vmem>>) attributes {dimension_semantics = [], scalar_prefetch = 0 : i64, scratch_operands = 0 : i64, tpu.core_type = #tpu.core_type<tc>} {
    %c0 = arith.constant 0 : index
    %c0_0 = arith.constant 0 : index
    %0 = vector.load %arg1[%c0, %c0_0] : memref<128x128xf32, #tpu.memory_space<vmem>>, vector<128x128xf32>
    %c0_1 = arith.constant 0 : index
    %c0_2 = arith.constant 0 : index
    %1 = vector.load %arg2[%c0_1, %c0_2] : memref<40x128xf32, #tpu.memory_space<vmem>>, vector<40x128xf32>
    %c0_3 = arith.constant 0 : index
    %c0_4 = arith.constant 0 : index
    %2 = vector.load %arg0[%c0_3, %c0_4] : memref<8x384xf32, #tpu.memory_space<vmem>>, vector<8x128xf32>
    %cst = arith.constant dense<0.000000e+00> : vector<8x128xf32>
    %3 = tpu.matmul %2, %0, %cst {dimension_numbers = #tpu.dot_dimension_numbers<[1], [0], [0], [1], [0, 0, 1, 1], [], []>} : vector<8x128xf32>, vector<128x128xf32>, vector<8x128xf32> -> vector<8x128xf32>
    %cst_5 = arith.constant dense<0.000000e+00> : vector<8x128xf32>
    %4 = tpu.matmul %3, %0, %cst_5 {dimension_numbers = #tpu.dot_dimension_numbers<[1], [0], [0], [1], [0, 0, 1, 1], [], []>} : vector<8x128xf32>, vector<128x128xf32>, vector<8x128xf32> -> vector<8x128xf32>
    %5 = vector.extract_strided_slice %1 {offsets = [0, 0], sizes = [16, 8], strides = [1, 1]} : vector<40x128xf32> to vector<16x8xf32>
    %6 = vector.extract_strided_slice %1 {offsets = [0, 8], sizes = [16, 1], strides = [1, 1]} : vector<40x128xf32> to vector<16x1xf32>
    %cst_6 = arith.constant dense<0.000000e+00> : vector<16x128xf32>
    %7 = tpu.matmul %5, %4, %cst_6 {dimension_numbers = #tpu.dot_dimension_numbers<[1], [0], [0], [1], [0, 0, 1, 1], [], []>} : vector<16x8xf32>, vector<8x128xf32>, vector<16x128xf32> -> vector<16x128xf32>
    %8 = vector.broadcast %6 : vector<16x1xf32> to vector<16x128xf32>
    %9 = arith.addf %7, %8 : vector<16x128xf32>
    %cst_7 = arith.constant 0.000000e+00 : f32
    %10 = vector.broadcast %cst_7 : f32 to vector<16x128xf32>
    %11 = arith.maximumf %9, %10 : vector<16x128xf32>
    %c0_8 = arith.constant 0 : index
    %c128 = arith.constant 128 : index
    %12 = vector.load %arg0[%c0_8, %c128] : memref<8x384xf32, #tpu.memory_space<vmem>>, vector<8x256xf32>
    %13 = tpu.concatenate %11, %11 in 1 : vector<16x128xf32>, vector<16x128xf32> -> vector<16x256xf32>
    %14 = vector.shape_cast %13 : vector<16x256xf32> to vector<16x1x256xf32>
    %15 = vector.shape_cast %12 : vector<8x256xf32> to vector<1x8x256xf32>
    %16 = vector.broadcast %14 : vector<16x1x256xf32> to vector<16x8x256xf32>
    %17 = vector.broadcast %15 : vector<1x8x256xf32> to vector<16x8x256xf32>
    %18 = arith.mulf %16, %17 : vector<16x8x256xf32>
    %19 = vector.shape_cast %18 : vector<16x8x256xf32> to vector<128x256xf32>
    %20 = vector.extract_strided_slice %1 {offsets = [16, 0], sizes = [8, 128], strides = [1, 1]} : vector<40x128xf32> to vector<8x128xf32>
    %21 = vector.extract_strided_slice %1 {offsets = [25, 0], sizes = [8, 1], strides = [1, 1]} : vector<40x128xf32> to vector<8x1xf32>
    %cst_9 = arith.constant dense<0.000000e+00> : vector<8x256xf32>
    %22 = tpu.matmul %20, %19, %cst_9 {dimension_numbers = #tpu.dot_dimension_numbers<[1], [0], [0], [1], [0, 0, 1, 1], [], []>} : vector<8x128xf32>, vector<128x256xf32>, vector<8x256xf32> -> vector<8x256xf32>
    %23 = vector.broadcast %21 : vector<8x1xf32> to vector<8x256xf32>
    %24 = arith.addf %22, %23 : vector<8x256xf32>
    %cst_10 = arith.constant 0.000000e+00 : f32
    %25 = vector.broadcast %cst_10 : f32 to vector<8x256xf32>
    %26 = arith.maximumf %24, %25 : vector<8x256xf32>
    %27 = vector.extract_strided_slice %1 {offsets = [24, 0], sizes = [1, 8], strides = [1, 1]} : vector<40x128xf32> to vector<1x8xf32>
    %28 = vector.extract_strided_slice %1 {offsets = [24, 8], sizes = [1, 1], strides = [1, 1]} : vector<40x128xf32> to vector<1x1xf32>
    %cst_11 = arith.constant dense<0.000000e+00> : vector<1x256xf32>
    %29 = tpu.matmul %27, %26, %cst_11 {dimension_numbers = #tpu.dot_dimension_numbers<[1], [0], [0], [1], [0, 0, 1, 1], [], []>} : vector<1x8xf32>, vector<8x256xf32>, vector<1x256xf32> -> vector<1x256xf32>
    %30 = vector.broadcast %28 : vector<1x1xf32> to vector<1x256xf32>
    %31 = arith.addf %29, %30 : vector<1x256xf32>
    %32 = arith.negf %31 : vector<1x256xf32>
    %33 = math.exp %32 : vector<1x256xf32>
    %cst_12 = arith.constant 1.000000e+00 : f32
    %34 = vector.broadcast %cst_12 : f32 to vector<1x256xf32>
    %35 = arith.addf %34, %33 : vector<1x256xf32>
    %36 = arith.divf %34, %35 : vector<1x256xf32>
    %c0_13 = arith.constant 0 : index
    %c0_14 = arith.constant 0 : index
    %37 = vector.load %arg3[%c0_13, %c0_14] : memref<1x256xf32, #tpu.memory_space<vmem>>, vector<1x256xf32>
    tpu.vector_store %arg3[%c0_13, %c0_14], %36 {strides = array<i32>} : memref<1x256xf32, #tpu.memory_space<vmem>>, vector<1x256xf32>,
    return
  }
}

</mosaic_0001>

<bundles_post_ra>
// kernel: tpu_custom_call.1
= control target key start
LH: loop header
LB: loop body
LE: loop exit
PB: predicated region body
PF: predicated region fallthrough
CT: control target
= control target key end

     0   :  { %8 = vsyncpa [#allocation3], 0  ;;  %s1225_s0 = inlined_call_operand.hbm [shape: f32[8,384], index: 0, kind: input, shape index: {}]   ;;  %s1226_s1 = inlined_call_operand.hbm [shape: f32[128,128], index: 1, kind: input, shape index: {}]   ;;  %s1227_s2 = inlined_call_operand.hbm [shape: f32[40,128], index: 2, kind: input, shape index: {}]   ;;  %s1228_s3 = inlined_call_operand.hbm [shape: f32[1,256], index: 3, kind: output, shape index: {}]  }
   0x1   :  { %9 = vsyncpa [#allocation6], 0 }
   0x2   :  { %10 = vsyncpa [#allocation4], 0  ;;  %s1042_s12 = smov [#allocation5]  }
   0x3   :  { %s26_s13 = sshll.u32 %s1042_s12, 4  ;;  %s27_s13 = int_to_ptr.vmem [resolvable:$true] %s26_s13 }
   0x4   :  { %s964_s14 = scalar_lea.vmem %s27_s13, 2048  ;;  %p969_p1 = scmp.lt.s32.totalorder %s27_s13, %s27_s13 }
   0x5   :  { %p965_p0 = scmp.ne.s32.totalorder %s27_s13, %s964_s14  ;;  %p970_p2 = scmp.lt.s32.totalorder %s964_s14, %s964_s14 }
   0x7   :  { %p971_p3 = por %p970_p2, %p969_p1 }
   0x9   :  { %p972_p4 = pnand %p971_p3, %p965_p0 }
   0xb   :  { %975 = shalt.err (!%p972_p4)
}
   0xc   :  { %s1043_s15 = smov 128   ;;  %s1044_s16 = smov 8  }
   0xd   :  { %32 = dma.hbm_to_vmem [thread:$0]  %s1226_s1, 2048, %s27_s13, [#allocation6], %s1043_s15, %s1043_s15, %s1044_s16  }
   0xe   :  { %s1045_s19 = smov [#allocation2]   ;;  %s1046_s21 = smov [#allocation7]  }
   0xf   :  { %s17_s20 = sshll.u32 %s1045_s19, 4  ;;  %s38_s22 = sshll.u32 %s1046_s21, 4  ;;  %s18_s20 = int_to_ptr.vmem [resolvable:$true] %s17_s20  ;;  %s39_s22 = int_to_ptr.vmem [resolvable:$true] %s38_s22 }
  0x10   :  { %s984_s23 = scalar_lea.vmem %s18_s20, 384  ;;  %p989_p6 = scmp.lt.s32.totalorder %s18_s20, %s18_s20 }
  0x11   :  { %p985_p5 = scmp.ne.s32.totalorder %s18_s20, %s984_s23  ;;  %p990_p7 = scmp.lt.s32.totalorder %s984_s23, %s984_s23 }
  0x13   :  { %p991_p8 = por %p990_p7, %p989_p6 }
  0x15   :  { %p992_p9 = pnand %p991_p8, %p985_p5 }
  0x17   :  { %995 = shalt.err (!%p992_p9)
}
  0x18   :  { %20 = dma.hbm_to_vmem [thread:$0]  %s1225_s0, 384, %s18_s20, [#allocation3]  }
  0x19   :  { %s1004_s26 = scalar_lea.vmem %s39_s22, 640  ;;  %p1009_p11 = scmp.lt.s32.totalorder %s39_s22, %s39_s22 }
  0x1a   :  { %p1005_p10 = scmp.ne.s32.totalorder %s39_s22, %s1004_s26  ;;  %p1010_p12 = scmp.lt.s32.totalorder %s1004_s26, %s1004_s26 }
  0x1c   :  { %p1011_p13 = por %p1010_p12, %p1009_p11 }
  0x1e   :  { %p1012_p0 = pnand %p1011_p13, %p1005_p10 }
  0x20   :  { %1015 = shalt.err (!%p1012_p0)
}
  0x21   :  { %44 = dma.hbm_to_vmem [thread:$0]  %s1227_s2, 640, %s39_s22, [#allocation6], %s1043_s15, %s1043_s15, %s1044_s16  }
  0x22   :  { %1036 = dma.done.wait [#allocation3], 384  }
  0x23   :  { %1037 = vsyncadd [#allocation3], 4294966912 }
  0x24   :  { %1038 = dma.done.wait [#allocation6], 2688  }
  0x25   :  { %1039 = vsyncadd [#allocation6], 4294964608  ;;  %v1047_v0 = vmov 0.0   ;;  %vm1048_vm0 = vmmov 0   ;;  %v69_v1 = vld [vmem:[#allocation5 + $0x78] sm:$0xff]  ;;  %v68_v2 = vld [vmem:[#allocation5 + $0x70] sm:$0xff]  ;;  %v317_v30 = vlaneseq }
  0x26   :  { %860 = vmatprep.subr.mxu0 %v1047_v0  ;;  %892 = vmatprep.mubr.msk.f32.mxu0 %vm1048_vm0, %v1047_v0  ;;  %v67_v3 = vld [vmem:[#allocation5 + $0x68] sm:$0xff]  ;;  %v66_v4 = vld [vmem:[#allocation5 + $0x60] sm:$0xff]  ;;  %v65_v5 = vld [vmem:[#allocation5 + $0x58] sm:$0xff]  ;;  %vm226_vm1 = vcmask 64512   ;;  %v1049_v22 = vmov 8   ;;  %v1050_v26 = vmov 0  }
  0x27   :  { %895 = vmatprep.subr.mxu1 %v1047_v0  ;;  %927 = vmatprep.mubr.msk.f32.mxu1 %vm1048_vm0, %v1047_v0  ;;  %v64_v6 = vld [vmem:[#allocation5 + $0x50] sm:$0xff]  ;;  %v63_v7 = vld [vmem:[#allocation5 + $0x48] sm:$0xff]  ;;  %v62_v8 = vld [vmem:[#allocation5 + $0x40] sm:$0xff]  ;;  %v1051_v28 = vmov 1966171168   ;;  %v318_v33 = vshrl.u32 %v317_v30, 7 }
  0x28   :  { %861 = vmatpush3.msra.mxu0 %v69_v1  ;;  %896 = vmatpush3.msra.mxu1 %v69_v1  ;;  %v61_v9 = vld [vmem:[#allocation5 + $0x38] sm:$0xff]  ;;  %v60_v10 = vld [vmem:[#allocation5 + $0x30] sm:$0xff]  ;;  %v59_v11 = vld [vmem:[#allocation5 + $0x28] sm:$0xff]  ;;  %v315_v29 = vunpack.c.l.s4 %v1051_v28  ;;  %vm612_vm2 = vcmask 1046528   ;;  %s1052_s0 = smov [#allocation8]   ;;  %vm799_vm3 = vcmp.lt.s32.totalorder %v317_v30, 256 }
  0x29   :  { %862 = vmatprep.subr.mxu0 %v1047_v0  ;;  %897 = vmatprep.subr.mxu1 %v1047_v0  ;;  %v58_v12 = vld [vmem:[#allocation5 + $0x20] sm:$0xff]  ;;  %v57_v13 = vld [vmem:[#allocation5 + $0x18] sm:$0xff]  ;;  %v56_v14 = vld [vmem:[#allocation5 + $0x10] sm:$0xff]  ;;  %v1133_v54 = vsub.s32 0, %v318_v33  ;;  %v1135_v55 = vsub.s32 1, %v318_v33  ;;  %s808_s2 = sshll.u32 %s1052_s0, 4  ;;  %s809_s2 = int_to_ptr.vmem [resolvable:$true] %s808_s2 }
  0x2a   :  { %863 = vmatpush3.msra.mxu0 %v68_v2  ;;  %898 = vmatpush3.msra.mxu1 %v68_v2  ;;  %v55_v15 = vld [vmem:[#allocation5 + $0x8] sm:$0xff]  ;;  %v54_v16 = vld [vmem:[#allocation5] sm:$0xff]  ;;  %v1118_v23 = vld [vmem:[#allocation7 + $0x18] sm:$0xff]  ;;  %v316_v32 = vunpack.c.0.s8 %v315_v29  ;;  %s1016_s28 = scalar_lea.vmem %s809_s2, 32  ;;  %p1021_p2 = scmp.lt.s32.totalorder %s809_s2, %s809_s2 }
  0x2b   :  { %864 = vmatprep.subr.mxu0 %v1047_v0  ;;  %899 = vmatprep.subr.mxu1 %v1047_v0  ;;  %v75_v17 = vld [vmem:[#allocation2] sm:$0xff]  ;;  %v70_v20 = vld [vmem:[#allocation7] sm:$0xff]  ;;  %v1143_v63 = vld [vmem:[#allocation2 + $0x10] sm:$0xff]  ;;  %p1017_p1 = scmp.ne.s32.totalorder %s809_s2, %s1016_s28  ;;  %p1022_p3 = scmp.lt.s32.totalorder %s1016_s28, %s1016_s28 }
  0x2c   :  { %865 = vmatpush3.msra.mxu0 %v67_v3  ;;  %900 = vmatpush3.msra.mxu1 %v67_v3  ;;  %v71_v21 = vld [vmem:[#allocation7 + $0x8] sm:$0xff]  ;;  %v74_v27 = vld [vmem:[#allocation7 + $0x20] sm:$0xff]  ;;  %v1125_v39 = vsub.s32 %v316_v32, %v318_v33 }
  0x2d   :  { %866 = vmatprep.subr.mxu0 %v1047_v0  ;;  %901 = vmatprep.subr.mxu1 %v1047_v0  ;;  %p1023_p4 = por %p1022_p3, %p1021_p2 }
  0x2e   :  { %867 = vmatpush3.msra.mxu0 %v66_v4  ;;  %902 = vmatpush3.msra.mxu1 %v66_v4 }
  0x2f   :  { %868 = vmatprep.subr.mxu0 %v1047_v0  ;;  %903 = vmatprep.subr.mxu1 %v1047_v0  ;;  %p1024_p5 = pnand %p1023_p4, %p1017_p1 }
  0x30   :  { %869 = vmatpush3.msra.mxu0 %v65_v5  ;;  %904 = vmatpush3.msra.mxu1 %v65_v5 }
  0x31   :  { %870 = vmatprep.subr.mxu0 %v1047_v0  ;;  %905 = vmatprep.subr.mxu1 %v1047_v0 }
  0x32   :  { %871 = vmatpush3.msra.mxu0 %v64_v6  ;;  %906 = vmatpush3.msra.mxu1 %v64_v6 }
  0x33   :  { %872 = vmatprep.subr.mxu0 %v1047_v0  ;;  %907 = vmatprep.subr.mxu1 %v1047_v0 }
  0x34   :  { %873 = vmatpush3.msra.mxu0 %v63_v7  ;;  %908 = vmatpush3.msra.mxu1 %v63_v7 }
  0x35   :  { %874 = vmatprep.subr.mxu0 %v1047_v0  ;;  %909 = vmatprep.subr.mxu1 %v1047_v0 }
  0x36   :  { %875 = vmatpush3.msra.mxu0 %v62_v8  ;;  %910 = vmatpush3.msra.mxu1 %v62_v8 }
  0x37   :  { %876 = vmatprep.subr.mxu0 %v1047_v0  ;;  %911 = vmatprep.subr.mxu1 %v1047_v0 }
  0x38   :  { %877 = vmatpush3.msra.mxu0 %v61_v9  ;;  %912 = vmatpush3.msra.mxu1 %v61_v9 }
  0x39   :  { %878 = vmatprep.subr.mxu0 %v1047_v0  ;;  %913 = vmatprep.subr.mxu1 %v1047_v0 }
  0x3a   :  { %879 = vmatpush3.msra.mxu0 %v60_v10  ;;  %914 = vmatpush3.msra.mxu1 %v60_v10 }
  0x3b   :  { %880 = vmatprep.subr.mxu0 %v1047_v0  ;;  %915 = vmatprep.subr.mxu1 %v1047_v0 }
  0x3c   :  { %881 = vmatpush3.msra.mxu0 %v59_v11  ;;  %916 = vmatpush3.msra.mxu1 %v59_v11 }
  0x3d   :  { %882 = vmatprep.subr.mxu0 %v1047_v0  ;;  %917 = vmatprep.subr.mxu1 %v1047_v0 }
  0x3e   :  { %883 = vmatpush3.msra.mxu0 %v58_v12  ;;  %918 = vmatpush3.msra.mxu1 %v58_v12 }
  0x3f   :  { %884 = vmatprep.subr.mxu0 %v1047_v0  ;;  %919 = vmatprep.subr.mxu1 %v1047_v0 }
  0x40   :  { %885 = vmatpush3.msra.mxu0 %v57_v13  ;;  %920 = vmatpush3.msra.mxu1 %v57_v13 }
  0x41   :  { %886 = vmatprep.subr.mxu0 %v1047_v0  ;;  %921 = vmatprep.subr.mxu1 %v1047_v0 }
  0x42   :  { %887 = vmatpush3.msra.mxu0 %v56_v14  ;;  %922 = vmatpush3.msra.mxu1 %v56_v14 }
  0x43   :  { %888 = vmatprep.subr.mxu0 %v1047_v0  ;;  %923 = vmatprep.subr.mxu1 %v1047_v0 }
  0x44   :  { %889 = vmatpush3.msra.mxu0 %v55_v15  ;;  %924 = vmatpush3.msra.mxu1 %v55_v15 }
  0x45   :  { %890 = vmatprep.subr.mxu0 %v1047_v0  ;;  %925 = vmatprep.subr.mxu1 %v1047_v0 }
  0x46   :  { %891 = vmatpush3.msra.mxu0 %v54_v16  ;;  %926 = vmatpush3.msra.mxu1 %v54_v16 }
  0x47   :  { %893 = vmatmul.mubr.f32.vlgmr.msra.gmra.mxu0 %v75_v17  ;;  %946 = vset.pattern.permute.xlu0 %v1049_v22 }
  0x48   :  { %932 = vmatprep.mubr.msk.f32.mxu0 %vm226_vm1, %v70_v20  ;;  %223 = vperm.xlu0 %946, %v71_v21  }
  0x49   :  { %947 = vset.pattern.permute.xlu1 %v1050_v26 }
  0x4a   :  { %606 = vperm.xlu1 %947, %v1118_v23  }
  0x4c   :  { %218 = vperm.xlu0 %946, %v70_v20  }
  0x4e   :  { %610 = vperm.xlu1 %947, %v74_v27  }
  0x50   :  { %691 = vperm.xlu0 %946, %v1118_v23  }
  0xc3   :  { %v224_v31 = vpop.permute.xlu0 %223 }
  0xc7   :  { %v219_v36 = vpop.permute.xlu0 %218 }
 0x107   :  { %v142_v18 = vpop.f32.mrf.mxu0 }
 0x108   :  { %928 = vmatmul.mubr.f32.vlgmr.msra.gmra.mxu1 %v142_v18 }
 0x109   :  { %v894_v19 = vpop.f32.mrf.mxu0  ;;  %681 = vmatprep.mubr.f32.mxu1 %v1047_v0 }
 0x1c8   :  { %v212_v24 = vpop.f32.mrf.mxu1 }
 0x1c9   :  { %930 = vmatprep.subr.mxu0 %v212_v24 }
 0x1ca   :  { %v929_v25 = vpop.f32.mrf.mxu1  ;;  %931 = vmatpush3.msra.mxu0 %v212_v24 }
 0x1cb   :  { %933 = vmatmul.mubr.msk.f32.vlgmr.msra.gmra.mxu0 %vm226_vm1, %v71_v21 }
 0x1cc   :  { %760 = vmatprep.mubr.f32.mxu0 %v1047_v0  ;;  %v1145_v0 = vld [vmem:[#allocation2 + $0x8] sm:$0xff] }
 0x28b   :  { %v934_v34 = vpop.f32.mrf.mxu0 }
 0x28c   :  { %v303_v35 = vadd.f32 %v934_v34, %v224_v31 }
 0x28d   :  { %v297_v37 = vpop.f32.mrf.mxu0 }
 0x28e   :  { %v307_v38 = vmax.f32 %v303_v35, 0.0  ;;  %v298_v40 = vadd.f32 %v297_v37, %v219_v36 }
 0x290   :  { %v362_v41 = vcombine.low %v307_v38, %v307_v38  ;;  %v363_v42 = vcombine.high %v307_v38, %v307_v38  ;;  %v306_v43 = vmax.f32 %v298_v40, 0.0 }
 0x292   :  { %v370_v44 = vrot.slane %v362_v41, %v1125_v39  ;;  %v377_v45 = vrot.slane %v363_v42, %v1125_v39  ;;  %v313_v46 = vcombine.high %v306_v43, %v306_v43  ;;  %v312_v61 = vcombine.low %v306_v43, %v306_v43 }
 0x294   :  { %v378_v47 = vcombine.high %v370_v44, %v370_v44  ;;  %v379_v48 = vcombine.high %v377_v45, %v377_v45  ;;  %v393_v49 = vrot.slane %v377_v45, %v1125_v39  ;;  %v327_v52 = vrot.slane %v313_v46, %v1125_v39 }
 0x295   :  { %v1138_v57 = vrot.slane %v370_v44, %v1125_v39  ;;  %v320_v12 = vrot.slane %v312_v61, %v1125_v39 }
 0x296   :  { %v407_v50 = vrot.slane %v379_v48, %v1125_v39  ;;  %v409_v51 = vcombine.high %v393_v49, %v393_v49  ;;  %v400_v53 = vrot.slane %v378_v47, %v1125_v39  ;;  %v329_v62 = vcombine.high %v327_v52, %v327_v52 }
 0x297   :  { %v515_v8 = vrot.slane %v393_v49, %v1135_v55  ;;  %v408_v9 = vcombine.high %v1138_v57, %v1138_v57  ;;  %v511_v11 = vrot.slane %v393_v49, %v1133_v54  ;;  %v343_v18 = vrot.slane %v327_v52, %v1125_v39 }
 0x298   :  { %v411_v56 = vcombine.high %v407_v50, %v407_v50  ;;  %v531_v60 = vrot.slane %v409_v51, %v1135_v55  ;;  %v527_v1 = vrot.slane %v409_v51, %v1133_v54  ;;  %v523_v4 = vrot.slane %v407_v50, %v1135_v55 }
 0x299   :  { %v410_v5 = vcombine.high %v400_v53, %v400_v53  ;;  %v519_v6 = vrot.slane %v407_v50, %v1133_v54  ;;  %v357_v13 = vrot.slane %v329_v62, %v1125_v39  ;;  %v597_v19 = vmul.f32 %v515_v8, %v1143_v63 }
 0x29a   :  { %v539_v58 = vrot.slane %v411_v56, %v1135_v55  ;;  %v535_v59 = vrot.slane %v411_v56, %v1133_v54  ;;  %v601_v7 = vmul.f32 %v531_v60, %v1143_v63  ;;  %v600_v10 = vmul.f32 %v527_v1, %v1145_v0 }
 0x29b   :  { %v599_v14 = vmul.f32 %v523_v4, %v1143_v63  ;;  %v507_v15 = vrot.slane %v410_v5, %v1135_v55  ;;  %v598_v16 = vmul.f32 %v519_v6, %v1145_v0  ;;  %v503_v17 = vrot.slane %v410_v5, %v1133_v54 }
 0x29c   :  { %v603_v2 = vmul.f32 %v539_v58, %v1143_v63  ;;  %v602_v3 = vmul.f32 %v535_v59, %v1145_v0  ;;  %v499_v20 = vrot.slane %v408_v9, %v1135_v55  ;;  %v596_v21 = vmul.f32 %v511_v11, %v1145_v0 }
 0x29d   :  { %v495_v22 = vrot.slane %v408_v9, %v1133_v54  ;;  %v328_v24 = vcombine.high %v320_v12, %v320_v12  ;;  %v595_v25 = vmul.f32 %v507_v15, %v1143_v63  ;;  %v491_v26 = vrot.slane %v400_v53, %v1135_v55 }
 0x29e   :  { %617 = vmatprep.subr.mxu1 %v603_v2  ;;  %v361_v27 = vcombine.high %v357_v13, %v357_v13  ;;  %v594_v28 = vmul.f32 %v503_v17, %v1145_v0  ;;  %v487_v29 = vrot.slane %v400_v53, %v1133_v54  ;;  %v593_v31 = vmul.f32 %v499_v20, %v1143_v63  ;;  %v72_v17 = vld [vmem:[#allocation7 + $0x10] sm:$0xff] }
 0x29f   :  { %618 = vmatpush1.msra.mxu1 %v602_v3  ;;  %v483_v32 = vrot.slane %v1138_v57, %v1135_v55  ;;  %v359_v33 = vcombine.high %v343_v18, %v343_v18  ;;  %v592_v34 = vmul.f32 %v495_v22, %v1145_v0  ;;  %v479_v35 = vrot.slane %v1138_v57, %v1133_v54 }
 0x2a0   :  { %619 = vmatprep.subr.mxu1 %v601_v7  ;;  %v350_v36 = vrot.slane %v328_v24, %v1125_v39  ;;  %v591_v37 = vmul.f32 %v491_v26, %v1143_v63  ;;  %v475_v38 = vrot.slane %v361_v27, %v1135_v55  ;;  %v590_v40 = vmul.f32 %v487_v29, %v1145_v0 }
 0x2a1   :  { %620 = vmatpush1.msra.mxu1 %v600_v10  ;;  %v471_v41 = vrot.slane %v361_v27, %v1133_v54  ;;  %v336_v42 = vrot.slane %v320_v12, %v1125_v39  ;;  %v589_v43 = vmul.f32 %v483_v32, %v1143_v63  ;;  %v467_v44 = vrot.slane %v359_v33, %v1135_v55 }
 0x2a2   :  { %621 = vmatprep.subr.mxu1 %v599_v14  ;;  %v588_v45 = vmul.f32 %v479_v35, %v1145_v0  ;;  %v463_v46 = vrot.slane %v359_v33, %v1133_v54  ;;  %v587_v47 = vmul.f32 %v475_v38, %v1143_v63  ;;  %v459_v48 = vrot.slane %v357_v13, %v1135_v55 }
 0x2a3   :  { %622 = vmatpush1.msra.mxu1 %v598_v16  ;;  %v360_v49 = vcombine.high %v350_v36, %v350_v36  ;;  %v586_v50 = vmul.f32 %v471_v41, %v1145_v0  ;;  %v455_v51 = vrot.slane %v357_v13, %v1133_v54  ;;  %v585_v52 = vmul.f32 %v467_v44, %v1143_v63 }
 0x2a4   :  { %623 = vmatprep.subr.mxu1 %v597_v19  ;;  %v451_v53 = vrot.slane %v343_v18, %v1135_v55  ;;  %v358_v56 = vcombine.high %v336_v42, %v336_v42  ;;  %v584_v57 = vmul.f32 %v463_v46, %v1145_v0  ;;  %v447_v58 = vrot.slane %v343_v18, %v1133_v54 }
 0x2a5   :  { %624 = vmatpush1.msra.mxu1 %v596_v21  ;;  %v583_v59 = vmul.f32 %v459_v48, %v1143_v63  ;;  %v443_v60 = vrot.slane %v360_v49, %v1135_v55  ;;  %v582_v61 = vmul.f32 %v455_v51, %v1145_v0  ;;  %v439_v62 = vrot.slane %v360_v49, %v1133_v54 }
 0x2a6   :  { %625 = vmatprep.subr.mxu1 %v595_v25  ;;  %v581_v1 = vmul.f32 %v451_v53, %v1143_v63  ;;  %v435_v2 = vrot.slane %v358_v56, %v1135_v55  ;;  %v580_v3 = vmul.f32 %v447_v58, %v1145_v0  ;;  %v431_v4 = vrot.slane %v358_v56, %v1133_v54 }
 0x2a7   :  { %626 = vmatpush1.msra.mxu1 %v594_v28  ;;  %v579_v5 = vmul.f32 %v443_v60, %v1143_v63  ;;  %v427_v6 = vrot.slane %v350_v36, %v1135_v55  ;;  %v578_v7 = vmul.f32 %v439_v62, %v1145_v0  ;;  %v423_v8 = vrot.slane %v350_v36, %v1133_v54 }
 0x2a8   :  { %627 = vmatprep.subr.mxu1 %v593_v31  ;;  %v577_v9 = vmul.f32 %v435_v2, %v1143_v63  ;;  %v419_v10 = vrot.slane %v336_v42, %v1135_v55  ;;  %v576_v11 = vmul.f32 %v431_v4, %v1145_v0  ;;  %v415_v12 = vrot.slane %v336_v42, %v1133_v54  ;;  %v607_v55 = vpop.permute.xlu1 %606 }
 0x2a9   :  { %628 = vmatpush1.msra.mxu1 %v592_v34  ;;  %v575_v13 = vmul.f32 %v427_v6, %v1143_v63  ;;  %v574_v14 = vmul.f32 %v423_v8, %v1145_v0  ;;  %v613_v19 = vrot.slane %v607_v55, 1 }
 0x2aa   :  { %629 = vmatprep.subr.mxu1 %v591_v37  ;;  %v573_v15 = vmul.f32 %v419_v10, %v1143_v63  ;;  %v572_v16 = vmul.f32 %v415_v12, %v1145_v0  ;;  %v692_v63 = vpop.permute.xlu0 %691 }
 0x2ab   :  { %630 = vmatpush1.msra.mxu1 %v590_v40 }
 0x2ac   :  { %631 = vmatprep.subr.mxu1 %v589_v43  ;;  %v611_v18 = vpop.permute.xlu1 %610 }
 0x2ad   :  { %632 = vmatpush1.msra.mxu1 %v588_v45  ;;  %v614_v54 = vrot.slane %v611_v18, 1 }
 0x2ae   :  { %633 = vmatprep.subr.mxu1 %v587_v47 }
 0x2af   :  { %634 = vmatpush1.msra.mxu1 %v586_v50  ;;  %v615_v21 = vsel %vm612_vm2, %v613_v19, %v614_v54 }
 0x2b0   :  { %635 = vmatprep.subr.mxu1 %v585_v52 }
 0x2b1   :  { %636 = vmatpush1.msra.mxu1 %v584_v57 }
 0x2b2   :  { %637 = vmatprep.subr.mxu1 %v583_v59 }
 0x2b3   :  { %638 = vmatpush1.msra.mxu1 %v582_v61 }
 0x2b4   :  { %639 = vmatprep.subr.mxu1 %v581_v1 }
 0x2b5   :  { %640 = vmatpush1.msra.mxu1 %v580_v3 }
 0x2b6   :  { %641 = vmatprep.subr.mxu1 %v579_v5 }
 0x2b7   :  { %642 = vmatpush1.msra.mxu1 %v578_v7 }
 0x2b8   :  { %643 = vmatprep.subr.mxu1 %v577_v9 }
 0x2b9   :  { %644 = vmatpush1.msra.mxu1 %v576_v11 }
 0x2ba   :  { %645 = vmatprep.subr.mxu1 %v575_v13 }
 0x2bb   :  { %646 = vmatpush1.msra.mxu1 %v574_v14 }
 0x2bc   :  { %647 = vmatprep.subr.mxu1 %v573_v15 }
 0x2bd   :  { %648 = vmatpush1.msra.mxu1 %v572_v16 }
 0x2be   :  { %682 = vmatmul.mubr.f32.vlgmr.msra.gmra.mxu1 %v72_v17 }
 0x37e   :  { %v683_v20 = vpop.f32.mrf.mxu1 }
 0x37f   :  { %v684_v22 = vadd.f32 %v683_v20, %v615_v21 }
 0x380   :  { %v685_v24 = vpop.f32.mrf.mxu1 }
 0x381   :  { %v686_v25 = vadd.f32 %v685_v24, %v615_v21  ;;  %v688_v27 = vmax.f32 %v684_v22, 0.0 }
 0x383   :  { %v689_v26 = vmax.f32 %v686_v25, 0.0 }
 0x385   :  { %726 = vmatprep.subr.mxu0 %v689_v26 }
 0x386   :  { %727 = vmatpush1.msra.mxu0 %v688_v27 }
 0x387   :  { %820 = vmatmul.mubr.msk.f32.vlgmr.msra.gmra.mxu0 %vm226_vm1, %v1118_v23 }
 0x447   :  { %v762_v0 = vpop.f32.mrf.mxu0 }
 0x448   :  { %v763_v28 = vadd.f32 %v762_v0, %v692_v63 }
 0x449   :  { %v764_v29 = vpop.f32.mrf.mxu0 }
 0x44a   :  { %v821_v31 = vmul.f32 -1.442695, %v763_v28  ;;  %v765_v32 = vadd.f32 %v764_v29, %v692_v63 }
 0x44c   :  { %948 = vpow2.f32 %v821_v31  ;;  %v822_v33 = vmul.f32 -1.442695, %v765_v32 }
 0x44e   :  { %950 = vpow2.f32 %v822_v33 }
 0x459   :  { %v949_v34 = vpop.eup %948 }
 0x45a   :  { %v773_v35 = vadd.f32 1.0, %v949_v34 }
 0x45b   :  { %v951_v36 = vpop.eup %950 }
 0x45c   :  { %v774_v37 = vadd.f32 1.0, %v951_v36  ;;  %952 = vrcp.f32 %v773_v35 }
 0x45e   :  { %954 = vrcp.f32 %v774_v37 }
 0x469   :  { %v953_v38 = vpop.eup %952 }
 0x46b   :  { %v955_v40 = vpop.eup %954 }
 0x46c   :  { %v781_v41 = vcombine.low %v953_v38, %v955_v40 }
 0x46e   :  { %v788_v23 = vrot.slane %v781_v41, %v1125_v39 }
 0x470   :  { %v795_v42 = vrot.slane %v788_v23, %v1125_v39 }
 0x472   :  { %801 = vst.msk [vmem:[#allocation8] sm:$0x3] %vm799_vm3, %v795_v42 }
 0x473   :  { %1027 = shalt.err (!%p1024_p5)
}
 0x474   :  { %811 = dma.vmem_to_hbm [thread:$0]  %s809_s2, 32, %s1228_s3, [#allocation4]  }
 0x475   :  { %1040 = dma.done.wait [#allocation4], 32  }
 0x476   :  { %1041 = vsyncadd [#allocation4], 4294967264 }
 0x477   :  { %815 = vsyncpa [#allocation3], 1 }
 0x478   :  { %816 = vsyncpa [#allocation6], 1 }
 0x479   :  { %817 = vsyncpa [#allocation4], 1 }

</bundles_post_ra>
